<compile_context>
chip_gen: v6e
topology: v6e:2x2x1
jax: 0.10.0
libtpu: 0.0.40
codegen_flags: <defaults>
</compile_context>

<pallas_src>
import functools

import jax
import jax.numpy as jnp
from jax.experimental import pallas as pl
from jax.experimental.pallas import tpu as pltpu

BN_EPS = 1e-5


# ----------------------------------------------------------------------------
# Tiling helpers
# ----------------------------------------------------------------------------
def _round_up(x, m):
    return (x + m - 1) // m * m


def _pick_tiles(M, K, N):
    """Choose (tm, tk, tn) and padded (Mp, Kp, Np) for the tiled matmul."""
    # ---- rows (sublane axis) ----
    if M <= 512:
        tm = _round_up(M, 8)
        Mp = tm
    else:
        cands = (512, 256, 128)
        wastes = {c: _round_up(M, c) - M for c in cands}
        min_w = min(wastes.values())
        # Prefer the largest tile whose padding waste is within 64 dead rows
        # of the minimum (big tiles amortize per-step overhead; dead rows are
        # wasted MXU cadence).
        tm = max(c for c in cands if wastes[c] <= min_w + 64)
        Mp = _round_up(M, tm)

    # ---- reduction axis (multiple of 128) ----
    Kp = _round_up(K, 128)
    if Kp <= 1024 or (Kp <= 2048 and tm <= 256):
        tk = Kp
    else:
        tk = 128
        for cand in (1536, 1024, 768, 512, 384, 256, 128):
            if Kp % cand == 0:
                tk = cand
                break

    # ---- output columns (lane axis, multiple of 128 -> lane-dense stores) ----
    Np = _round_up(N, 128)
    tn = Np if Np <= 512 else 512

    # Keep >=2 tiles on at least one 'parallel' axis so v7x's two TensorCores
    # both get work even at small batch / small spatial.
    if Mp // tm == 1 and Np // tn == 1 and Np >= 256 and (Np // 2) % 128 == 0:
        tn = Np // 2
    return tm, tk, tn, Mp, Kp, Np


# ----------------------------------------------------------------------------
# Pallas kernels
# ----------------------------------------------------------------------------
def _mm_kernel(x_ref, w_ref, b_ref, *rest, relu, has_res):
    """Tiled matmul: bf16 operands, fp32 VMEM accumulation, fused bias /
    residual-add / ReLU epilogue on the last K step, bf16 output.

    NOTE: writing o_ref only under pl.when(k == last) is correct ONLY because
    the output block index is constant across the K axis and K is the
    innermost ('arbitrary') grid axis.  Do not reorder the grid or change the
    out index_map without revisiting this.
    """
    if has_res:
        r_ref, o_ref, acc_ref = rest
    else:
        o_ref, acc_ref = rest

    k = pl.program_id(2)

    @pl.when(k == 0)
    def _():
        acc_ref[...] = jnp.zeros_like(acc_ref)

    acc_ref[...] += jnp.dot(x_ref[...], w_ref[...],
                            preferred_element_type=jnp.float32)

    @pl.when(k == pl.num_programs(2) - 1)
    def _():
        acc = acc_ref[...] + b_ref[...]
        if has_res:
            acc = acc + r_ref[...].astype(jnp.float32)
        if relu:
            acc = jnp.maximum(acc, 0.0)
        o_ref[...] = acc.astype(o_ref.dtype)


@functools.partial(jax.jit, static_argnames=("relu",))
def matmul_bias(x, w, b, residual=None, relu=False):
    """(M,K) @ (K,N) + b [+ residual] [-> ReLU], tiled over (M, N, K).

    bf16 operands on the MXU, fp32 accumulation / bias / residual / epilogue,
    bf16 result.  Pad/slice copies are skipped when shapes are already
    tile-aligned.
    """
    M, K = x.shape
    _, N = w.shape
    tm, tk, tn, Mp, Kp, Np = _pick_tiles(M, K, N)

    xb = x.astype(jnp.bfloat16)
    if (Mp, Kp) != (M, K):
        xb = jnp.pad(xb, ((0, Mp - M), (0, Kp - K)))
    wb = w.astype(jnp.bfloat16)
    if (Kp, Np) != (K, N):
        wb = jnp.pad(wb, ((0, Kp - K), (0, Np - N)))
    bb = b.astype(jnp.float32)
    if Np != N:
        bb = jnp.pad(bb, (0, Np - N))
    bb = bb.reshape(1, Np)

    has_res = residual is not None
    in_specs = [
        pl.BlockSpec((tm, tk), lambda i, j, k: (i, k)),
        pl.BlockSpec((tk, tn), lambda i, j, k: (k, j)),
        pl.BlockSpec((1, tn), lambda i, j, k: (0, j)),
    ]
    args = [xb, wb, bb]
    if has_res:
        rb = residual.astype(jnp.bfloat16)
        if (Mp, Np) != residual.shape:
            rb = jnp.pad(rb, ((0, Mp - M), (0, Np - N)))
        in_specs.append(pl.BlockSpec((tm, tn), lambda i, j, k: (i, j)))
        args.append(rb)

    # Explicit VMEM budget: double-buffered bf16 x/w/out (+residual),
    # fp32 accumulator scratch, bias.  Keeps the plan inside v5e's 16 MiB
    # scoped default and well under v7x's 64 MiB/TC.
    vmem_bytes = (2 * (tm * tk + tk * tn + tm * tn) * 2
                  + (2 * tm * tn * 2 if has_res else 0)
                  + tm * tn * 4 + 2 * tn * 4)
    vmem_limit = int(min(max(vmem_bytes * 3 // 2 + (2 << 20), 16 << 20),
                         48 << 20))

    out = pl.pallas_call(
        functools.partial(_mm_kernel, relu=relu, has_res=has_res),
        out_shape=jax.ShapeDtypeStruct((Mp, Np), jnp.bfloat16),
        grid=(Mp // tm, Np // tn, Kp // tk),
        in_specs=in_specs,
        out_specs=pl.BlockSpec((tm, tn), lambda i, j, k: (i, j)),
        scratch_shapes=[pltpu.VMEM((tm, tn), jnp.float32)],
        compiler_params=pltpu.CompilerParams(
            dimension_semantics=("parallel", "parallel", "arbitrary"),
            vmem_limit_bytes=vmem_limit),
    )(*args)
    if (Mp, Np) != (M, N):
        out = out[:M, :N]
    return out


def _head_kernel(x_ref, w_ref, b_ref, emb_ref, y_ref, *, inv_hw):
    """Fused global-average-pool + classifier FC (whole arrays in VMEM)."""
    x = x_ref[...].astype(jnp.float32)           # (N, HW, C)
    emb = jnp.sum(x, axis=1) * inv_hw            # (N, C) fp32
    emb_ref[...] = emb
    y_ref[...] = (jnp.dot(emb.astype(jnp.bfloat16), w_ref[...],
                          preferred_element_type=jnp.float32)
                  + b_ref[...])


@jax.jit
def gap_fc_head(x, fc_w, fc_b):
    """x: (N, HW, C) bf16 -> (embedding (N,C) fp32, logits (N,num_classes) fp32).

    One Pallas call for AdaptiveAvgPool2d(1) + Linear: the (N,HW,C) tail fits
    VMEM whole, so there is no intermediate HBM round trip of the embedding.
    """
    N, HW, C = x.shape
    Cout = fc_w.shape[1]
    Np = _round_up(Cout, 128)
    wb = fc_w.astype(jnp.bfloat16)
    if Np != Cout:
        wb = jnp.pad(wb, ((0, 0), (0, Np - Cout)))
    bb = fc_b.astype(jnp.float32)
    if Np != Cout:
        bb = jnp.pad(bb, (0, Np - Cout))
    bb = bb.reshape(1, Np)

    vmem_bytes = N * HW * C * 2 + C * Np * 2 + N * C * 4 + N * Np * 4
    vmem_limit = int(min(max(vmem_bytes * 2 + (2 << 20), 16 << 20), 48 << 20))

    emb, y = pl.pallas_call(
        functools.partial(_head_kernel, inv_hw=1.0 / HW),
        out_shape=(jax.ShapeDtypeStruct((N, C), jnp.float32),
                   jax.ShapeDtypeStruct((N, Np), jnp.float32)),
        compiler_params=pltpu.CompilerParams(vmem_limit_bytes=vmem_limit),
    )(x, wb, bb)
    if Np != Cout:
        y = y[:, :Cout]
    return emb, y


# ----------------------------------------------------------------------------
# JAX glue: im2col, BN folding, pooling, parameter construction
# ----------------------------------------------------------------------------
def im2col(x, kh, kw, stride, pad):
    """x: (N,H,W,C) bf16 -> patches (N*OH*OW, kh*kw*C), plus output shape.

    Patches are sliced/concatenated in bf16 (no fp32 blowup)."""
    n, h, w, c = x.shape
    x = x.astype(jnp.bfloat16)
    if pad:
        x = jnp.pad(x, ((0, 0), (pad, pad), (pad, pad), (0, 0)))
    hp, wp = h + 2 * pad, w + 2 * pad
    oh = (hp - kh) // stride + 1
    ow = (wp - kw) // stride + 1
    cols = []
    for i in range(kh):
        for j in range(kw):
            cols.append(x[:, i:i + stride * oh:stride,
                          j:j + stride * ow:stride, :])
    patches = cols[0] if len(cols) == 1 else jnp.concatenate(cols, axis=-1)
    return patches.reshape(n * oh * ow, kh * kw * c), (n, oh, ow)


def fold_bn(p):
    """Fold BatchNorm (eval mode) into conv weight/bias."""
    scale = p['gamma'] / jnp.sqrt(p['var'] + BN_EPS)
    w = p['w'] * scale                      # broadcast over cout (last dim)
    b = p['beta'] - p['mean'] * scale
    return w, b


@functools.partial(jax.jit, static_argnames=("stride", "pad", "relu"))
def conv_bn(x, p, stride, pad, relu, residual=None):
    """Conv + folded BN (+ optional fused residual add) (+ optional ReLU).

    Input and output activations are bf16."""
    kh, kw, cin, cout = p['w'].shape
    w, b = fold_bn(p)
    patches, (n, oh, ow) = im2col(x, kh, kw, stride, pad)
    out = matmul_bias(patches, w.reshape(kh * kw * cin, cout), b,
                      residual=residual, relu=relu)
    return out.reshape(n, oh, ow, cout)


def maxpool_3x3_s2(x):
    # TODO(synk): single small pooling op kept as lax.reduce_window glue
    # (not the hot path); runs in bf16.
    return jax.lax.reduce_window(
        x, jnp.array(-jnp.inf, dtype=x.dtype), jax.lax.max,
        window_dimensions=(1, 3, 3, 1), window_strides=(1, 2, 2, 1),
        padding=((0, 0), (1, 1), (1, 1), (0, 0)))


def bottleneck(x, blk):
    s = blk['stride']
    if 'downsample' in blk:
        identity = conv_bn(x, blk['downsample'], stride=s, pad=0, relu=False)
    else:
        identity = x
    out = conv_bn(x, blk['conv1'], stride=1, pad=0, relu=True)
    out = conv_bn(out, blk['conv2'], stride=s, pad=1, relu=True)
    ni, hi, wi, ci = identity.shape
    # conv3 with the residual add + ReLU fused into the matmul epilogue;
    # residual streamed in bf16 and added in the fp32 accumulator.
    out = conv_bn(out, blk['conv3'], stride=1, pad=0, relu=True,
                  residual=identity.reshape(ni * hi * wi, ci))
    return out


def conv_bn_params(key, k, cin, cout):
    std = (2.0 / (k * k * cin)) ** 0.5
    w = jax.random.normal(key, (k, k, cin, cout), jnp.float32) * std
    return dict(w=w,
                gamma=jnp.ones((cout,), jnp.float32),
                beta=jnp.zeros((cout,), jnp.float32),
                mean=jnp.zeros((cout,), jnp.float32),
                var=jnp.ones((cout,), jnp.float32))


def make_params(key, image_num_classes=76):
    """Deterministic synthetic ResNet-50 + classifier parameters."""
    keys = iter(jax.random.split(key, 256))
    params = {'conv1': conv_bn_params(next(keys), 7, 3, 64)}
    layer_cfg = [(64, 3, 1), (128, 4, 2), (256, 6, 2), (512, 3, 2)]
    inplanes = 64
    layers = []
    for width, nblocks, stride in layer_cfg:
        blocks = []
        for bi in range(nblocks):
            s = stride if bi == 0 else 1
            out = width * 4
            blk = dict(conv1=conv_bn_params(next(keys), 1, inplanes, width),
                       conv2=conv_bn_params(next(keys), 3, width, width),
                       conv3=conv_bn_params(next(keys), 1, width, out),
                       stride=s)
            if s != 1 or inplanes != out:
                blk['downsample'] = conv_bn_params(next(keys), 1, inplanes, out)
            blocks.append(blk)
            inplanes = out
        layers.append(blocks)
    params['layers'] = layers
    visual_features = 2048
    bound = 1.0 / (visual_features ** 0.5)
    params['fc_w'] = jax.random.uniform(
        next(keys), (visual_features, image_num_classes), jnp.float32,
        -bound, bound)
    params['fc_b'] = jax.random.uniform(
        next(keys), (image_num_classes,), jnp.float32, -bound, bound)
    return params


def image_encoder_forward(x_nchw, params):
    """Returns (visual_embedding (N,2048), logits (N,76)) like the nn.Module."""
    x = jnp.transpose(x_nchw, (0, 2, 3, 1)).astype(jnp.bfloat16)  # NCHW->NHWC
    x = conv_bn(x, params['conv1'], stride=2, pad=3, relu=True)
    x = maxpool_3x3_s2(x)
    for blocks in params['layers']:
        for blk in blocks:
            x = bottleneck(x, blk)
    n, h, w, c = x.shape
    visual_embedding, y = gap_fc_head(x.reshape(n, h * w, c),
                                      params['fc_w'], params['fc_b'])
    return visual_embedding, y


if __name__ == "__main__":
    key = jax.random.PRNGKey(0)
    pkey, xkey = jax.random.split(key)
    params = make_params(pkey)
    # Small input consistent with resnet50 forward: NCHW, 3 channels.
    x = jax.random.normal(xkey, (2, 3, 32, 32), jnp.float32)
    emb, y = image_encoder_forward(x, params)
    jax.block_until_ready((emb, y))
    assert emb.shape == (2, 2048), emb.shape
    assert y.shape == (2, 76), y.shape
    assert bool(jnp.all(jnp.isfinite(emb))) and bool(jnp.all(jnp.isfinite(y)))
    print("KERNEL_OK")
</pallas_src>

<mosaic_0001>
module attributes {stable_mosaic.version = 11 : i64} {
  func.func @_mm_kernel(%arg0: i32, %arg1: i32, %arg2: i32, %arg3: memref<512x256xbf16, #tpu.memory_space<vmem>>, %arg4: memref<256x128xbf16, #tpu.memory_space<vmem>>, %arg5: memref<1x128xf32, #tpu.memory_space<vmem>>, %arg6: memref<512x128xbf16, #tpu.memory_space<vmem>>, %arg7: memref<512x128xf32, #tpu.memory_space<vmem>>) attributes {dimension_semantics = [#tpu.dimension_semantics<parallel>, #tpu.dimension_semantics<parallel>, #tpu.dimension_semantics<arbitrary>], iteration_bounds = array<i64: 1, 1, 1>, scalar_prefetch = 0 : i64, scratch_operands = 1 : i64, tpu.core_type = #tpu.core_type<tc>, window_params = [{transform_indices = @transform_0, window_bounds = array<i64: 512, 256>}, {transform_indices = @transform_1, window_bounds = array<i64: 256, 128>}, {transform_indices = @transform_2, window_bounds = array<i64: 1, 128>}, {transform_indices = @transform_3, window_bounds = array<i64: 512, 128>}]} {
    %c0_i32 = arith.constant 0 : i32
    %0 = arith.cmpi eq, %arg2, %c0_i32 : i32
    %1 = arith.extui %0 : i1 to i32
    %c0_i32_0 = arith.constant 0 : i32
    %2 = arith.cmpi ne, %1, %c0_i32_0 : i32
    scf.if %2 {
      %cst_10 = arith.constant 0.000000e+00 : f32
      %12 = vector.broadcast %cst_10 : f32 to vector<512x128xf32>
      %c0_11 = arith.constant 0 : index
      %c0_12 = arith.constant 0 : index
      %13 = vector.load %arg7[%c0_11, %c0_12] : memref<512x128xf32, #tpu.memory_space<vmem>>, vector<512x128xf32>
      tpu.vector_store %arg7[%c0_11, %c0_12], %12 {strides = array<i32>} : memref<512x128xf32, #tpu.memory_space<vmem>>, vector<512x128xf32>,
    } else {
    }
    %c0 = arith.constant 0 : index
    %c0_1 = arith.constant 0 : index
    %3 = vector.load %arg7[%c0, %c0_1] : memref<512x128xf32, #tpu.memory_space<vmem>>, vector<512x128xf32>
    %c0_2 = arith.constant 0 : index
    %c0_3 = arith.constant 0 : index
    %4 = vector.load %arg3[%c0_2, %c0_3] : memref<512x256xbf16, #tpu.memory_space<vmem>>, vector<512x256xbf16>
    %c0_4 = arith.constant 0 : index
    %c0_5 = arith.constant 0 : index
    %5 = vector.load %arg4[%c0_4, %c0_5] : memref<256x128xbf16, #tpu.memory_space<vmem>>, vector<256x128xbf16>
    %cst = arith.constant dense<0.000000e+00> : vector<512x128xf32>
    %6 = tpu.matmul %4, %5, %cst {dimension_numbers = #tpu.dot_dimension_numbers<[1], [0], [0], [1], [0, 0, 1, 1], [], []>} : vector<512x256xbf16>, vector<256x128xbf16>, vector<512x128xf32> -> vector<512x128xf32>
    %7 = arith.addf %3, %6 : vector<512x128xf32>
    %c0_6 = arith.constant 0 : index
    %c0_7 = arith.constant 0 : index
    %8 = vector.load %arg7[%c0_6, %c0_7] : memref<512x128xf32, #tpu.memory_space<vmem>>, vector<512x128xf32>
    tpu.vector_store %arg7[%c0_6, %c0_7], %7 {strides = array<i32>} : memref<512x128xf32, #tpu.memory_space<vmem>>, vector<512x128xf32>,
    %c0_i32_8 = arith.constant 0 : i32
    %9 = arith.cmpi eq, %arg2, %c0_i32_8 : i32
    %10 = arith.extui %9 : i1 to i32
    %c0_i32_9 = arith.constant 0 : i32
    %11 = arith.cmpi ne, %10, %c0_i32_9 : i32
    scf.if %11 {
      %c0_10 = arith.constant 0 : index
      %c0_11 = arith.constant 0 : index
      %12 = vector.load %arg7[%c0_10, %c0_11] : memref<512x128xf32, #tpu.memory_space<vmem>>, vector<512x128xf32>
      %c0_12 = arith.constant 0 : index
      %c0_13 = arith.constant 0 : index
      %13 = vector.load %arg5[%c0_12, %c0_13] : memref<1x128xf32, #tpu.memory_space<vmem>>, vector<1x128xf32>
      %14 = vector.broadcast %13 : vector<1x128xf32> to vector<512x128xf32>
      %15 = arith.addf %12, %14 : vector<512x128xf32>
      %cst_14 = arith.constant 0.000000e+00 : f32
      %16 = vector.broadcast %cst_14 : f32 to vector<512x128xf32>
      %17 = arith.maximumf %15, %16 : vector<512x128xf32>
      %18 = arith.truncf %17 : vector<512x128xf32> to vector<512x128xbf16>
      %c0_15 = arith.constant 0 : index
      %c0_16 = arith.constant 0 : index
      %19 = vector.load %arg6[%c0_15, %c0_16] : memref<512x128xbf16, #tpu.memory_space<vmem>>, vector<512x128xbf16>
      tpu.vector_store %arg6[%c0_15, %c0_16], %18 {strides = array<i32>} : memref<512x128xbf16, #tpu.memory_space<vmem>>, vector<512x128xbf16>,
    } else {
    }
    return
  }
  func.func @transform_0(%arg0: i32, %arg1: i32, %arg2: i32) -> (i32, i32) {
    %c0_i32 = arith.constant 0 : i32
    return %arg0, %arg2 : i32, i32
  }
  func.func @transform_1(%arg0: i32, %arg1: i32, %arg2: i32) -> (i32, i32) {
    %c0_i32 = arith.constant 0 : i32
    return %arg2, %arg1 : i32, i32
  }
  func.func @transform_2(%arg0: i32, %arg1: i32, %arg2: i32) -> (i32, i32) {
    %c0_i32 = arith.constant 0 : i32
    %c0_i32_0 = arith.constant 0 : i32
    return %c0_i32, %arg1 : i32, i32
  }
  func.func @transform_3(%arg0: i32, %arg1: i32, %arg2: i32) -> (i32, i32) {
    %c0_i32 = arith.constant 0 : i32
    return %arg0, %arg1 : i32, i32
  }
}

</mosaic_0001>

<bundles_post_ra>
// kernel: matmul_bias.1
= control target key start
LH: loop header
LB: loop body
LE: loop exit
PB: predicated region body
PF: predicated region fallthrough
CT: control target
= control target key end

     0   :  { %v2147_v0 = vmov 0   ;;  %s2605_s1 = inlined_call_operand.vmem [shape: bf16[256,128], index: 1, kind: input, shape index: {}]   ;;  %s2606_s0 = inlined_call_operand.vmem [shape: bf16[512,256], index: 0, kind: input, shape index: {}]   ;;  %s2607_s2 = inlined_call_operand.vmem [shape: f32[1,128], index: 2, kind: input, shape index: {}]   ;;  %s2608_s3 = inlined_call_operand.vmem [shape: bf16[512,128], index: 3, kind: output, shape index: {}]  }
   0x1   :  { %659 = vmatprep.subr.bf16.mxu0 %v2147_v0  ;;  %2002 = vmatprep.subr.bf16.mxu1 %v2147_v0  ;;  %v2035_v1 = vld [vmem:[%s2605_s1 + $0x38] sm:$0xff]   ;;  %v2036_v2 = vld [vmem:[%s2605_s1 + $0x30] sm:$0xff]   ;;  %v2037_v3 = vld [vmem:[%s2605_s1 + $0x28] sm:$0xff]  }
   0x2   :  { %660 = vmatpush1.bf16.msra.mxu0 %v2035_v1  ;;  %2018 = vmatpush1.bf16.msra.mxu1 %v2035_v1  ;;  %v2038_v4 = vld [vmem:[%s2605_s1 + $0x20] sm:$0xff]   ;;  %v2039_v5 = vld [vmem:[%s2605_s1 + $0x18] sm:$0xff]   ;;  %v2040_v7 = vld [vmem:[%s2605_s1 + $0x10] sm:$0xff]  }
   0x3   :  { %661 = vmatprep.subr.bf16.mxu0 %v2147_v0  ;;  %2003 = vmatprep.subr.bf16.mxu1 %v2147_v0  ;;  %v2053_v6 = vld [vmem:[%s2606_s0 + $0x4] ss:$8 sps:$4 sm:$0xff]   ;;  %v2043_v11 = vld [vmem:[%s2605_s1 + $0x78] sm:$0xff]   ;;  %v2044_v12 = vld [vmem:[%s2605_s1 + $0x70] sm:$0xff]  }
   0x4   :  { %v2056_v8 = vld [vmem:[%s2606_s0 + $0x104] ss:$8 sps:$4 sm:$0xff]   ;;  %691 = vmatprep.mubr.bf16.mxu0 %v2053_v6  ;;  %v2047_v15 = vld [vmem:[%s2605_s1 + $0x58] sm:$0xff]   ;;  %v2048_v16 = vld [vmem:[%s2605_s1 + $0x50] sm:$0xff]  }
   0x5   :  { %819 = vmatprep.mubr.bf16.mxu1 %v2056_v8  ;;  %v2041_v9 = vld [vmem:[%s2605_s1 + $0x8] sm:$0xff]   ;;  %v2042_v10 = vld [vmem:[%s2605_s1] sm:$0xff]   ;;  %v2057_v21 = vld [vmem:[%s2606_s0 + $0x14] ss:$8 sps:$4 sm:$0xff]  }
   0x6   :  { %662 = vmatpush1.bf16.msra.mxu0 %v2036_v2  ;;  %2019 = vmatpush1.bf16.msra.mxu1 %v2036_v2  ;;  %v2045_v13 = vld [vmem:[%s2605_s1 + $0x68] sm:$0xff]   ;;  %v2046_v14 = vld [vmem:[%s2605_s1 + $0x60] sm:$0xff]   ;;  %v2059_v22 = vld [vmem:[%s2606_s0 + $0x114] ss:$8 sps:$4 sm:$0xff]  }
   0x7   :  { %663 = vmatprep.subr.bf16.mxu0 %v2147_v0  ;;  %2004 = vmatprep.subr.bf16.mxu1 %v2147_v0  ;;  %v2049_v17 = vld [vmem:[%s2605_s1 + $0x48] sm:$0xff]   ;;  %v2050_v18 = vld [vmem:[%s2605_s1 + $0x40] sm:$0xff]   ;;  %v2061_v23 = vld [vmem:[%s2606_s0 + $0x10] ss:$8 sps:$4 sm:$0xff]  }
   0x8   :  { %v2051_v19 = vld [vmem:[%s2606_s0] ss:$8 sps:$4 sm:$0xff]   ;;  %v2062_v24 = vld [vmem:[%s2606_s0 + $0x110] ss:$8 sps:$4 sm:$0xff]   ;;  %v2063_v25 = vld [vmem:[%s2606_s0 + $0x24] ss:$8 sps:$4 sm:$0xff]  }
   0x9   :  { %v2054_v20 = vld [vmem:[%s2606_s0 + $0x100] ss:$8 sps:$4 sm:$0xff]   ;;  %v2065_v26 = vld [vmem:[%s2606_s0 + $0x124] ss:$8 sps:$4 sm:$0xff]   ;;  %v2069_v29 = vld [vmem:[%s2606_s0 + $0x34] ss:$8 sps:$4 sm:$0xff]  }
   0xa   :  { %664 = vmatpush1.bf16.msra.mxu0 %v2037_v3  ;;  %2020 = vmatpush1.bf16.msra.mxu1 %v2037_v3  ;;  %v2067_v27 = vld [vmem:[%s2606_s0 + $0x20] ss:$8 sps:$4 sm:$0xff]   ;;  %v2071_v30 = vld [vmem:[%s2606_s0 + $0x134] ss:$8 sps:$4 sm:$0xff]   ;;  %v2073_v31 = vld [vmem:[%s2606_s0 + $0x30] ss:$8 sps:$4 sm:$0xff]  }
   0xb   :  { %665 = vmatprep.subr.bf16.mxu0 %v2147_v0  ;;  %2005 = vmatprep.subr.bf16.mxu1 %v2147_v0  ;;  %v2068_v28 = vld [vmem:[%s2606_s0 + $0x120] ss:$8 sps:$4 sm:$0xff]   ;;  %v2074_v32 = vld [vmem:[%s2606_s0 + $0x130] ss:$8 sps:$4 sm:$0xff]   ;;  %v2075_v33 = vld [vmem:[%s2606_s0 + $0x44] ss:$8 sps:$4 sm:$0xff]  }
   0xc   :  { %v2077_v34 = vld [vmem:[%s2606_s0 + $0x144] ss:$8 sps:$4 sm:$0xff]   ;;  %v2079_v35 = vld [vmem:[%s2606_s0 + $0x40] ss:$8 sps:$4 sm:$0xff]   ;;  %v2081_v37 = vld [vmem:[%s2606_s0 + $0x54] ss:$8 sps:$4 sm:$0xff]  }
   0xd   :  { %v2080_v36 = vld [vmem:[%s2606_s0 + $0x140] ss:$8 sps:$4 sm:$0xff]   ;;  %v2083_v38 = vld [vmem:[%s2606_s0 + $0x154] ss:$8 sps:$4 sm:$0xff]   ;;  %v2085_v39 = vld [vmem:[%s2606_s0 + $0x50] ss:$8 sps:$4 sm:$0xff]  }
   0xe   :  { %666 = vmatpush1.bf16.msra.mxu0 %v2038_v4  ;;  %2021 = vmatpush1.bf16.msra.mxu1 %v2038_v4  ;;  %v2086_v40 = vld [vmem:[%s2606_s0 + $0x150] ss:$8 sps:$4 sm:$0xff]   ;;  %v2087_v41 = vld [vmem:[%s2606_s0 + $0x64] ss:$8 sps:$4 sm:$0xff]   ;;  %v2091_v43 = vld [vmem:[%s2606_s0 + $0x60] ss:$8 sps:$4 sm:$0xff]  }
   0xf   :  { %667 = vmatprep.subr.bf16.mxu0 %v2147_v0  ;;  %2006 = vmatprep.subr.bf16.mxu1 %v2147_v0  ;;  %v2089_v42 = vld [vmem:[%s2606_s0 + $0x164] ss:$8 sps:$4 sm:$0xff]   ;;  %v2092_v44 = vld [vmem:[%s2606_s0 + $0x160] ss:$8 sps:$4 sm:$0xff]   ;;  %v2093_v45 = vld [vmem:[%s2606_s0 + $0x74] ss:$8 sps:$4 sm:$0xff]  }
  0x10   :  { %v2095_v46 = vld [vmem:[%s2606_s0 + $0x174] ss:$8 sps:$4 sm:$0xff]   ;;  %v2097_v47 = vld [vmem:[%s2606_s0 + $0x70] ss:$8 sps:$4 sm:$0xff]   ;;  %v2099_v49 = vld [vmem:[%s2606_s0 + $0x84] ss:$8 sps:$4 sm:$0xff]  }
  0x11   :  { %v2098_v48 = vld [vmem:[%s2606_s0 + $0x170] ss:$8 sps:$4 sm:$0xff]   ;;  %v2101_v50 = vld [vmem:[%s2606_s0 + $0x184] ss:$8 sps:$4 sm:$0xff]   ;;  %v2103_v51 = vld [vmem:[%s2606_s0 + $0x80] ss:$8 sps:$4 sm:$0xff]  }
  0x12   :  { %668 = vmatpush1.bf16.msra.mxu0 %v2039_v5  ;;  %2022 = vmatpush1.bf16.msra.mxu1 %v2039_v5  ;;  %v2104_v52 = vld [vmem:[%s2606_s0 + $0x180] ss:$8 sps:$4 sm:$0xff]   ;;  %v2105_v53 = vld [vmem:[%s2606_s0 + $0x94] ss:$8 sps:$4 sm:$0xff]   ;;  %v2109_v55 = vld [vmem:[%s2606_s0 + $0x90] ss:$8 sps:$4 sm:$0xff]  }
  0x13   :  { %669 = vmatprep.subr.bf16.mxu0 %v2147_v0  ;;  %2007 = vmatprep.subr.bf16.mxu1 %v2147_v0  ;;  %v2107_v54 = vld [vmem:[%s2606_s0 + $0x194] ss:$8 sps:$4 sm:$0xff]   ;;  %v2110_v56 = vld [vmem:[%s2606_s0 + $0x190] ss:$8 sps:$4 sm:$0xff]   ;;  %v2111_v57 = vld [vmem:[%s2606_s0 + $0xa4] ss:$8 sps:$4 sm:$0xff]  }
  0x14   :  { %v2113_v58 = vld [vmem:[%s2606_s0 + $0x1a4] ss:$8 sps:$4 sm:$0xff]   ;;  %v2115_v59 = vld [vmem:[%s2606_s0 + $0xa0] ss:$8 sps:$4 sm:$0xff]   ;;  %v2117_v61 = vld [vmem:[%s2606_s0 + $0xb4] ss:$8 sps:$4 sm:$0xff]  }
  0x15   :  { %v2116_v60 = vld [vmem:[%s2606_s0 + $0x1a0] ss:$8 sps:$4 sm:$0xff]   ;;  %v2119_v62 = vld [vmem:[%s2606_s0 + $0x1b4] ss:$8 sps:$4 sm:$0xff]   ;;  %v2121_v63 = vld [vmem:[%s2606_s0 + $0xb0] ss:$8 sps:$4 sm:$0xff]  }
  0x16   :  { %670 = vmatpush1.bf16.msra.mxu0 %v2040_v7  ;;  %2023 = vmatpush1.bf16.msra.mxu1 %v2040_v7  ;;  %v2123_v1 = vld [vmem:[%s2606_s0 + $0xc4] ss:$8 sps:$4 sm:$0xff]   ;;  %v2127_v3 = vld [vmem:[%s2606_s0 + $0xc0] ss:$8 sps:$4 sm:$0xff]   ;;  %v2129_v5 = vld [vmem:[%s2606_s0 + $0xd4] ss:$8 sps:$4 sm:$0xff]  }
  0x17   :  { %671 = vmatprep.subr.bf16.mxu0 %v2147_v0  ;;  %2008 = vmatprep.subr.bf16.mxu1 %v2147_v0  ;;  %v2125_v2 = vld [vmem:[%s2606_s0 + $0x1c4] ss:$8 sps:$4 sm:$0xff]   ;;  %v2128_v4 = vld [vmem:[%s2606_s0 + $0x1c0] ss:$8 sps:$4 sm:$0xff]   ;;  %v2131_v6 = vld [vmem:[%s2606_s0 + $0x1d4] ss:$8 sps:$4 sm:$0xff]  }
  0x18   :  { %v2133_v7 = vld [vmem:[%s2606_s0 + $0xd0] ss:$8 sps:$4 sm:$0xff]  }
  0x19   :  { %v2134_v8 = vld [vmem:[%s2606_s0 + $0x1d0] ss:$8 sps:$4 sm:$0xff]  }
  0x1a   :  { %672 = vmatpush1.bf16.msra.mxu0 %v2041_v9  ;;  %2024 = vmatpush1.bf16.msra.mxu1 %v2041_v9  ;;  %v2135_v9 = vld [vmem:[%s2606_s0 + $0xe4] ss:$8 sps:$4 sm:$0xff]  }
  0x1b   :  { %673 = vmatprep.subr.bf16.mxu0 %v2147_v0  ;;  %2009 = vmatprep.subr.bf16.mxu1 %v2147_v0 }
  0x1e   :  { %674 = vmatpush1.bf16.msra.mxu0 %v2042_v10  ;;  %2025 = vmatpush1.bf16.msra.mxu1 %v2042_v10  ;;  %v2137_v10 = vld [vmem:[%s2606_s0 + $0x1e4] ss:$8 sps:$4 sm:$0xff]  }
  0x1f   :  { %675 = vmatprep.subr.bf16.mxu0 %v2147_v0  ;;  %2010 = vmatprep.subr.bf16.mxu1 %v2147_v0 }
  0x22   :  { %676 = vmatpush2.bf16.msra.mxu0 %v2043_v11  ;;  %2026 = vmatpush2.bf16.msra.mxu1 %v2043_v11  ;;  %v2139_v11 = vld [vmem:[%s2606_s0 + $0xe0] ss:$8 sps:$4 sm:$0xff]  }
  0x23   :  { %677 = vmatprep.subr.bf16.mxu0 %v2147_v0  ;;  %2011 = vmatprep.subr.bf16.mxu1 %v2147_v0 }
  0x26   :  { %678 = vmatpush2.bf16.msra.mxu0 %v2044_v12  ;;  %2027 = vmatpush2.bf16.msra.mxu1 %v2044_v12  ;;  %v2140_v12 = vld [vmem:[%s2606_s0 + $0x1e0] ss:$8 sps:$4 sm:$0xff]  }
  0x27   :  { %679 = vmatprep.subr.bf16.mxu0 %v2147_v0  ;;  %2012 = vmatprep.subr.bf16.mxu1 %v2147_v0 }
  0x2a   :  { %680 = vmatpush2.bf16.msra.mxu0 %v2045_v13  ;;  %2028 = vmatpush2.bf16.msra.mxu1 %v2045_v13  ;;  %v2141_v13 = vld [vmem:[%s2606_s0 + $0xf4] ss:$8 sps:$4 sm:$0xff]  }
  0x2b   :  { %681 = vmatprep.subr.bf16.mxu0 %v2147_v0  ;;  %2013 = vmatprep.subr.bf16.mxu1 %v2147_v0 }
  0x2e   :  { %682 = vmatpush2.bf16.msra.mxu0 %v2046_v14  ;;  %2029 = vmatpush2.bf16.msra.mxu1 %v2046_v14  ;;  %v2143_v14 = vld [vmem:[%s2606_s0 + $0x1f4] ss:$8 sps:$4 sm:$0xff]  }
  0x2f   :  { %683 = vmatprep.subr.bf16.mxu0 %v2147_v0  ;;  %2014 = vmatprep.subr.bf16.mxu1 %v2147_v0 }
  0x32   :  { %684 = vmatpush2.bf16.msra.mxu0 %v2047_v15  ;;  %2030 = vmatpush2.bf16.msra.mxu1 %v2047_v15  ;;  %v2145_v15 = vld [vmem:[%s2606_s0 + $0xf0] ss:$8 sps:$4 sm:$0xff]  }
  0x33   :  { %685 = vmatprep.subr.bf16.mxu0 %v2147_v0  ;;  %2015 = vmatprep.subr.bf16.mxu1 %v2147_v0 }
  0x36   :  { %686 = vmatpush2.bf16.msra.mxu0 %v2048_v16  ;;  %2031 = vmatpush2.bf16.msra.mxu1 %v2048_v16  ;;  %v2146_v16 = vld [vmem:[%s2606_s0 + $0x1f0] ss:$8 sps:$4 sm:$0xff]  }
  0x37   :  { %687 = vmatprep.subr.bf16.mxu0 %v2147_v0  ;;  %2016 = vmatprep.subr.bf16.mxu1 %v2147_v0 }
  0x3a   :  { %688 = vmatpush2.bf16.msra.mxu0 %v2049_v17  ;;  %2032 = vmatpush2.bf16.msra.mxu1 %v2049_v17 }
  0x3b   :  { %689 = vmatprep.subr.bf16.mxu0 %v2147_v0  ;;  %2017 = vmatprep.subr.bf16.mxu1 %v2147_v0  ;;  %v2122_v0 = vld [vmem:[%s2606_s0 + $0x1b0] ss:$8 sps:$4 sm:$0xff]  }
  0x3e   :  { %690 = vmatpush2.bf16.msra.mxu0 %v2050_v18  ;;  %2033 = vmatpush2.bf16.msra.mxu1 %v2050_v18  ;;  %v2443_v18 = vld [vmem:[%s2607_s2] ss:$0 sm:$0xff] }
  0x41   :  { %692 = vmatmul.mubr.bf16.vlgmr.msra.gmra.mxu0 %v2051_v19  ;;  %820 = vmatmul.mubr.bf16.vlgmr.msra.gmra.mxu1 %v2054_v20 }
  0x42   :  { %699 = vmatprep.mubr.bf16.mxu0 %v2057_v21  ;;  %827 = vmatprep.mubr.bf16.mxu1 %v2059_v22 }
  0x49   :  { %700 = vmatmul.mubr.bf16.gmra.mxu0 %v2061_v23  ;;  %828 = vmatmul.mubr.bf16.gmra.mxu1 %v2062_v24 }
  0x4a   :  { %707 = vmatprep.mubr.bf16.mxu0 %v2063_v25  ;;  %835 = vmatprep.mubr.bf16.mxu1 %v2065_v26 }
  0x51   :  { %708 = vmatmul.mubr.bf16.gmra.mxu0 %v2067_v27  ;;  %836 = vmatmul.mubr.bf16.gmra.mxu1 %v2068_v28 }
  0x52   :  { %715 = vmatprep.mubr.bf16.mxu0 %v2069_v29  ;;  %843 = vmatprep.mubr.bf16.mxu1 %v2071_v30 }
  0x59   :  { %716 = vmatmul.mubr.bf16.gmra.mxu0 %v2073_v31  ;;  %844 = vmatmul.mubr.bf16.gmra.mxu1 %v2074_v32 }
  0x5a   :  { %723 = vmatprep.mubr.bf16.mxu0 %v2075_v33  ;;  %851 = vmatprep.mubr.bf16.mxu1 %v2077_v34 }
  0x61   :  { %724 = vmatmul.mubr.bf16.gmra.mxu0 %v2079_v35  ;;  %852 = vmatmul.mubr.bf16.gmra.mxu1 %v2080_v36 }
  0x62   :  { %731 = vmatprep.mubr.bf16.mxu0 %v2081_v37  ;;  %859 = vmatprep.mubr.bf16.mxu1 %v2083_v38 }
  0x69   :  { %732 = vmatmul.mubr.bf16.gmra.mxu0 %v2085_v39  ;;  %860 = vmatmul.mubr.bf16.gmra.mxu1 %v2086_v40 }
  0x6a   :  { %739 = vmatprep.mubr.bf16.mxu0 %v2087_v41  ;;  %867 = vmatprep.mubr.bf16.mxu1 %v2089_v42 }
  0x71   :  { %740 = vmatmul.mubr.bf16.gmra.mxu0 %v2091_v43  ;;  %868 = vmatmul.mubr.bf16.gmra.mxu1 %v2092_v44 }
  0x72   :  { %747 = vmatprep.mubr.bf16.mxu0 %v2093_v45  ;;  %875 = vmatprep.mubr.bf16.mxu1 %v2095_v46 }
  0x79   :  { %748 = vmatmul.mubr.bf16.gmra.mxu0 %v2097_v47  ;;  %876 = vmatmul.mubr.bf16.gmra.mxu1 %v2098_v48 }
  0x7a   :  { %755 = vmatprep.mubr.bf16.mxu0 %v2099_v49  ;;  %883 = vmatprep.mubr.bf16.mxu1 %v2101_v50 }
  0x81   :  { %756 = vmatmul.mubr.bf16.gmra.mxu0 %v2103_v51  ;;  %884 = vmatmul.mubr.bf16.gmra.mxu1 %v2104_v52 }
  0x82   :  { %763 = vmatprep.mubr.bf16.mxu0 %v2105_v53  ;;  %891 = vmatprep.mubr.bf16.mxu1 %v2107_v54 }
  0x89   :  { %764 = vmatmul.mubr.bf16.gmra.mxu0 %v2109_v55  ;;  %892 = vmatmul.mubr.bf16.gmra.mxu1 %v2110_v56 }
  0x8a   :  { %771 = vmatprep.mubr.bf16.mxu0 %v2111_v57  ;;  %899 = vmatprep.mubr.bf16.mxu1 %v2113_v58 }
  0x91   :  { %772 = vmatmul.mubr.bf16.gmra.mxu0 %v2115_v59  ;;  %900 = vmatmul.mubr.bf16.gmra.mxu1 %v2116_v60 }
  0x92   :  { %779 = vmatprep.mubr.bf16.mxu0 %v2117_v61  ;;  %907 = vmatprep.mubr.bf16.mxu1 %v2119_v62 }
  0x99   :  { %780 = vmatmul.mubr.bf16.gmra.mxu0 %v2121_v63  ;;  %908 = vmatmul.mubr.bf16.gmra.mxu1 %v2122_v0 }
  0x9a   :  { %787 = vmatprep.mubr.bf16.mxu0 %v2123_v1  ;;  %915 = vmatprep.mubr.bf16.mxu1 %v2125_v2 }
  0xa1   :  { %788 = vmatmul.mubr.bf16.gmra.mxu0 %v2127_v3  ;;  %916 = vmatmul.mubr.bf16.gmra.mxu1 %v2128_v4 }
  0xa2   :  { %795 = vmatprep.mubr.bf16.mxu0 %v2129_v5  ;;  %923 = vmatprep.mubr.bf16.mxu1 %v2131_v6 }
  0xa9   :  { %796 = vmatmul.mubr.bf16.gmra.mxu0 %v2133_v7  ;;  %924 = vmatmul.mubr.bf16.gmra.mxu1 %v2134_v8 }
  0xaa   :  { %803 = vmatprep.mubr.bf16.mxu0 %v2135_v9  ;;  %931 = vmatprep.mubr.bf16.mxu1 %v2137_v10 }
  0xb1   :  { %804 = vmatmul.mubr.bf16.gmra.mxu0 %v2139_v11  ;;  %932 = vmatmul.mubr.bf16.gmra.mxu1 %v2140_v12 }
  0xb2   :  { %811 = vmatprep.mubr.bf16.mxu0 %v2141_v13  ;;  %939 = vmatprep.mubr.bf16.mxu1 %v2143_v14 }
  0xb9   :  { %812 = vmatmul.mubr.bf16.gmra.mxu0 %v2145_v15  ;;  %940 = vmatmul.mubr.bf16.gmra.mxu1 %v2146_v16 }
 0x101   :  { %v693_v17 = vpop.f32.mrf.mxu0  ;;  %v821_v19 = vpop.f32.mrf.mxu1 }
 0x102   :  { %v1150_v22 = vadd.f32 %v2443_v18, %v693_v17  ;;  %v1182_v23 = vadd.f32 %v2443_v18, %v821_v19 }
 0x103   :  { %v695_v20 = vpop.f32.mrf.mxu0  ;;  %v823_v21 = vpop.f32.mrf.mxu1 }
 0x104   :  { %v1214_v30 = vmax.f32 %v1150_v22, 0.0  ;;  %v1246_v31 = vmax.f32 %v1182_v23, 0.0 }
 0x105   :  { %v696_v24 = vpop.f32.mrf.mxu0  ;;  %v824_v25 = vpop.f32.mrf.mxu1 }
 0x106   :  { %v1151_v26 = vadd.f32 %v2443_v18, %v696_v24  ;;  %v1183_v27 = vadd.f32 %v2443_v18, %v824_v25 }
 0x107   :  { %v698_v28 = vpop.f32.mrf.mxu0  ;;  %v826_v29 = vpop.f32.mrf.mxu1 }
 0x108   :  { %v1215_v32 = vmax.f32 %v1151_v26, 0.0  ;;  %v1247_v33 = vmax.f32 %v1183_v27, 0.0 }
 0x109   :  { %v701_v34 = vpop.f32.mrf.mxu0  ;;  %v829_v35 = vpop.f32.mrf.mxu1 }
 0x10a   :  { %v1814_v36 = vpack.c.bf16 %v1215_v32, %v1214_v30  ;;  %v1894_v37 = vpack.c.bf16 %v1247_v33, %v1246_v31  ;;  %v1152_v40 = vadd.f32 %v2443_v18, %v701_v34  ;;  %v1184_v41 = vadd.f32 %v2443_v18, %v829_v35 }
 0x10b   :  { %v703_v38 = vpop.f32.mrf.mxu0  ;;  %v831_v39 = vpop.f32.mrf.mxu1 }
 0x10c   :  { %1815 = vst [vmem:[%s2608_s3] sm:$0xff] %v1814_v36   ;;  %1986 = vst [vmem:[%s2608_s3 + $0x80] sm:$0xff] %v1894_v37   ;;  %v1216_v48 = vmax.f32 %v1152_v40, 0.0  ;;  %v1248_v49 = vmax.f32 %v1184_v41, 0.0 }
 0x10d   :  { %v704_v42 = vpop.f32.mrf.mxu0  ;;  %v832_v43 = vpop.f32.mrf.mxu1 }
 0x10e   :  { %v1153_v44 = vadd.f32 %v2443_v18, %v704_v42  ;;  %v1185_v45 = vadd.f32 %v2443_v18, %v832_v43 }
 0x10f   :  { %v706_v46 = vpop.f32.mrf.mxu0  ;;  %v834_v47 = vpop.f32.mrf.mxu1 }
 0x110   :  { %v1217_v50 = vmax.f32 %v1153_v44, 0.0  ;;  %v1249_v51 = vmax.f32 %v1185_v45, 0.0 }
 0x111   :  { %v709_v52 = vpop.f32.mrf.mxu0  ;;  %v837_v53 = vpop.f32.mrf.mxu1 }
 0x112   :  { %v1819_v54 = vpack.c.bf16 %v1217_v50, %v1216_v48  ;;  %v1899_v55 = vpack.c.bf16 %v1249_v51, %v1248_v49  ;;  %v1154_v58 = vadd.f32 %v2443_v18, %v709_v52  ;;  %v1186_v59 = vadd.f32 %v2443_v18, %v837_v53 }
 0x113   :  { %v711_v56 = vpop.f32.mrf.mxu0  ;;  %v839_v57 = vpop.f32.mrf.mxu1 }
 0x114   :  { %1971 = vst [vmem:[%s2608_s3 + $0x8] sm:$0xff] %v1819_v54   ;;  %1987 = vst [vmem:[%s2608_s3 + $0x88] sm:$0xff] %v1899_v55   ;;  %v1218_v2 = vmax.f32 %v1154_v58, 0.0  ;;  %v1250_v3 = vmax.f32 %v1186_v59, 0.0 }
 0x115   :  { %v712_v60 = vpop.f32.mrf.mxu0  ;;  %v840_v61 = vpop.f32.mrf.mxu1 }
 0x116   :  { %v1155_v62 = vadd.f32 %v2443_v18, %v712_v60  ;;  %v1187_v63 = vadd.f32 %v2443_v18, %v840_v61 }
 0x117   :  { %v714_v0 = vpop.f32.mrf.mxu0  ;;  %v842_v1 = vpop.f32.mrf.mxu1 }
 0x118   :  { %v1219_v4 = vmax.f32 %v1155_v62, 0.0  ;;  %v1251_v5 = vmax.f32 %v1187_v63, 0.0 }
 0x119   :  { %v717_v6 = vpop.f32.mrf.mxu0  ;;  %v845_v7 = vpop.f32.mrf.mxu1 }
 0x11a   :  { %v1824_v8 = vpack.c.bf16 %v1219_v4, %v1218_v2  ;;  %v1904_v9 = vpack.c.bf16 %v1251_v5, %v1250_v3  ;;  %v1156_v12 = vadd.f32 %v2443_v18, %v717_v6  ;;  %v1188_v13 = vadd.f32 %v2443_v18, %v845_v7 }
 0x11b   :  { %v719_v10 = vpop.f32.mrf.mxu0  ;;  %v847_v11 = vpop.f32.mrf.mxu1 }
 0x11c   :  { %1972 = vst [vmem:[%s2608_s3 + $0x10] sm:$0xff] %v1824_v8   ;;  %1988 = vst [vmem:[%s2608_s3 + $0x90] sm:$0xff] %v1904_v9   ;;  %v1220_v21 = vmax.f32 %v1156_v12, 0.0  ;;  %v1252_v22 = vmax.f32 %v1188_v13, 0.0 }
 0x11d   :  { %v720_v14 = vpop.f32.mrf.mxu0  ;;  %v848_v15 = vpop.f32.mrf.mxu1 }
 0x11e   :  { %v1157_v16 = vadd.f32 %v2443_v18, %v720_v14  ;;  %v1189_v17 = vadd.f32 %v2443_v18, %v848_v15 }
 0x11f   :  { %v722_v19 = vpop.f32.mrf.mxu0  ;;  %v850_v20 = vpop.f32.mrf.mxu1 }
 0x120   :  { %v1221_v23 = vmax.f32 %v1157_v16, 0.0  ;;  %v1253_v24 = vmax.f32 %v1189_v17, 0.0 }
 0x121   :  { %v725_v25 = vpop.f32.mrf.mxu0  ;;  %v853_v26 = vpop.f32.mrf.mxu1 }
 0x122   :  { %v1829_v27 = vpack.c.bf16 %v1221_v23, %v1220_v21  ;;  %v1909_v28 = vpack.c.bf16 %v1253_v24, %v1252_v22  ;;  %v1158_v31 = vadd.f32 %v2443_v18, %v725_v25  ;;  %v1190_v32 = vadd.f32 %v2443_v18, %v853_v26 }
 0x123   :  { %v727_v29 = vpop.f32.mrf.mxu0  ;;  %v855_v30 = vpop.f32.mrf.mxu1 }
 0x124   :  { %1973 = vst [vmem:[%s2608_s3 + $0x18] sm:$0xff] %v1829_v27   ;;  %1989 = vst [vmem:[%s2608_s3 + $0x98] sm:$0xff] %v1909_v28   ;;  %v1222_v39 = vmax.f32 %v1158_v31, 0.0  ;;  %v1254_v40 = vmax.f32 %v1190_v32, 0.0 }
 0x125   :  { %v728_v33 = vpop.f32.mrf.mxu0  ;;  %v856_v34 = vpop.f32.mrf.mxu1 }
 0x126   :  { %v1159_v35 = vadd.f32 %v2443_v18, %v728_v33  ;;  %v1191_v36 = vadd.f32 %v2443_v18, %v856_v34 }
 0x127   :  { %v730_v37 = vpop.f32.mrf.mxu0  ;;  %v858_v38 = vpop.f32.mrf.mxu1 }
 0x128   :  { %v1223_v41 = vmax.f32 %v1159_v35, 0.0  ;;  %v1255_v42 = vmax.f32 %v1191_v36, 0.0 }
 0x129   :  { %v733_v43 = vpop.f32.mrf.mxu0  ;;  %v861_v44 = vpop.f32.mrf.mxu1 }
 0x12a   :  { %v1834_v45 = vpack.c.bf16 %v1223_v41, %v1222_v39  ;;  %v1914_v46 = vpack.c.bf16 %v1255_v42, %v1254_v40  ;;  %v1160_v49 = vadd.f32 %v2443_v18, %v733_v43  ;;  %v1192_v50 = vadd.f32 %v2443_v18, %v861_v44 }
 0x12b   :  { %v735_v47 = vpop.f32.mrf.mxu0  ;;  %v863_v48 = vpop.f32.mrf.mxu1 }
 0x12c   :  { %1974 = vst [vmem:[%s2608_s3 + $0x20] sm:$0xff] %v1834_v45   ;;  %1990 = vst [vmem:[%s2608_s3 + $0xa0] sm:$0xff] %v1914_v46   ;;  %v1224_v57 = vmax.f32 %v1160_v49, 0.0  ;;  %v1256_v58 = vmax.f32 %v1192_v50, 0.0 }
 0x12d   :  { %v736_v51 = vpop.f32.mrf.mxu0  ;;  %v864_v52 = vpop.f32.mrf.mxu1 }
 0x12e   :  { %v1161_v53 = vadd.f32 %v2443_v18, %v736_v51  ;;  %v1193_v54 = vadd.f32 %v2443_v18, %v864_v52 }
 0x12f   :  { %v738_v55 = vpop.f32.mrf.mxu0  ;;  %v866_v56 = vpop.f32.mrf.mxu1 }
 0x130   :  { %v1225_v59 = vmax.f32 %v1161_v53, 0.0  ;;  %v1257_v60 = vmax.f32 %v1193_v54, 0.0 }
 0x131   :  { %v741_v61 = vpop.f32.mrf.mxu0  ;;  %v869_v62 = vpop.f32.mrf.mxu1 }
 0x132   :  { %v1839_v63 = vpack.c.bf16 %v1225_v59, %v1224_v57  ;;  %v1919_v0 = vpack.c.bf16 %v1257_v60, %v1256_v58  ;;  %v1162_v3 = vadd.f32 %v2443_v18, %v741_v61  ;;  %v1194_v4 = vadd.f32 %v2443_v18, %v869_v62 }
 0x133   :  { %v743_v1 = vpop.f32.mrf.mxu0  ;;  %v871_v2 = vpop.f32.mrf.mxu1 }
 0x134   :  { %1975 = vst [vmem:[%s2608_s3 + $0x28] sm:$0xff] %v1839_v63   ;;  %1991 = vst [vmem:[%s2608_s3 + $0xa8] sm:$0xff] %v1919_v0   ;;  %v1226_v11 = vmax.f32 %v1162_v3, 0.0  ;;  %v1258_v12 = vmax.f32 %v1194_v4, 0.0 }
 0x135   :  { %v744_v5 = vpop.f32.mrf.mxu0  ;;  %v872_v6 = vpop.f32.mrf.mxu1 }
 0x136   :  { %v1163_v7 = vadd.f32 %v2443_v18, %v744_v5  ;;  %v1195_v8 = vadd.f32 %v2443_v18, %v872_v6 }
 0x137   :  { %v746_v9 = vpop.f32.mrf.mxu0  ;;  %v874_v10 = vpop.f32.mrf.mxu1 }
 0x138   :  { %v1227_v13 = vmax.f32 %v1163_v7, 0.0  ;;  %v1259_v14 = vmax.f32 %v1195_v8, 0.0 }
 0x139   :  { %v749_v15 = vpop.f32.mrf.mxu0  ;;  %v877_v16 = vpop.f32.mrf.mxu1 }
 0x13a   :  { %v1844_v17 = vpack.c.bf16 %v1227_v13, %v1226_v11  ;;  %v1924_v19 = vpack.c.bf16 %v1259_v14, %v1258_v12  ;;  %v1164_v22 = vadd.f32 %v2443_v18, %v749_v15  ;;  %v1196_v23 = vadd.f32 %v2443_v18, %v877_v16 }
 0x13b   :  { %v751_v20 = vpop.f32.mrf.mxu0  ;;  %v879_v21 = vpop.f32.mrf.mxu1 }
 0x13c   :  { %1976 = vst [vmem:[%s2608_s3 + $0x30] sm:$0xff] %v1844_v17   ;;  %1992 = vst [vmem:[%s2608_s3 + $0xb0] sm:$0xff] %v1924_v19   ;;  %v1228_v30 = vmax.f32 %v1164_v22, 0.0  ;;  %v1260_v31 = vmax.f32 %v1196_v23, 0.0 }
 0x13d   :  { %v752_v24 = vpop.f32.mrf.mxu0  ;;  %v880_v25 = vpop.f32.mrf.mxu1 }
 0x13e   :  { %v1165_v26 = vadd.f32 %v2443_v18, %v752_v24  ;;  %v1197_v27 = vadd.f32 %v2443_v18, %v880_v25 }
 0x13f   :  { %v754_v28 = vpop.f32.mrf.mxu0  ;;  %v882_v29 = vpop.f32.mrf.mxu1 }
 0x140   :  { %v1229_v32 = vmax.f32 %v1165_v26, 0.0  ;;  %v1261_v33 = vmax.f32 %v1197_v27, 0.0 }
 0x141   :  { %v757_v34 = vpop.f32.mrf.mxu0  ;;  %v885_v35 = vpop.f32.mrf.mxu1 }
 0x142   :  { %v1849_v36 = vpack.c.bf16 %v1229_v32, %v1228_v30  ;;  %v1929_v37 = vpack.c.bf16 %v1261_v33, %v1260_v31  ;;  %v1166_v40 = vadd.f32 %v2443_v18, %v757_v34  ;;  %v1198_v41 = vadd.f32 %v2443_v18, %v885_v35 }
 0x143   :  { %v759_v38 = vpop.f32.mrf.mxu0  ;;  %v887_v39 = vpop.f32.mrf.mxu1 }
 0x144   :  { %1977 = vst [vmem:[%s2608_s3 + $0x38] sm:$0xff] %v1849_v36   ;;  %1993 = vst [vmem:[%s2608_s3 + $0xb8] sm:$0xff] %v1929_v37   ;;  %v1230_v48 = vmax.f32 %v1166_v40, 0.0  ;;  %v1262_v49 = vmax.f32 %v1198_v41, 0.0 }
 0x145   :  { %v760_v42 = vpop.f32.mrf.mxu0  ;;  %v888_v43 = vpop.f32.mrf.mxu1 }
 0x146   :  { %v1167_v44 = vadd.f32 %v2443_v18, %v760_v42  ;;  %v1199_v45 = vadd.f32 %v2443_v18, %v888_v43 }
 0x147   :  { %v762_v46 = vpop.f32.mrf.mxu0  ;;  %v890_v47 = vpop.f32.mrf.mxu1 }
 0x148   :  { %v1231_v50 = vmax.f32 %v1167_v44, 0.0  ;;  %v1263_v51 = vmax.f32 %v1199_v45, 0.0 }
 0x149   :  { %v765_v52 = vpop.f32.mrf.mxu0  ;;  %v893_v53 = vpop.f32.mrf.mxu1 }
 0x14a   :  { %v1854_v54 = vpack.c.bf16 %v1231_v50, %v1230_v48  ;;  %v1934_v55 = vpack.c.bf16 %v1263_v51, %v1262_v49  ;;  %v1168_v58 = vadd.f32 %v2443_v18, %v765_v52  ;;  %v1200_v59 = vadd.f32 %v2443_v18, %v893_v53 }
 0x14b   :  { %v767_v56 = vpop.f32.mrf.mxu0  ;;  %v895_v57 = vpop.f32.mrf.mxu1 }
 0x14c   :  { %1978 = vst [vmem:[%s2608_s3 + $0x40] sm:$0xff] %v1854_v54   ;;  %1994 = vst [vmem:[%s2608_s3 + $0xc0] sm:$0xff] %v1934_v55   ;;  %v1232_v2 = vmax.f32 %v1168_v58, 0.0  ;;  %v1264_v3 = vmax.f32 %v1200_v59, 0.0 }
 0x14d   :  { %v768_v60 = vpop.f32.mrf.mxu0  ;;  %v896_v61 = vpop.f32.mrf.mxu1 }
 0x14e   :  { %v1169_v62 = vadd.f32 %v2443_v18, %v768_v60  ;;  %v1201_v63 = vadd.f32 %v2443_v18, %v896_v61 }
 0x14f   :  { %v770_v0 = vpop.f32.mrf.mxu0  ;;  %v898_v1 = vpop.f32.mrf.mxu1 }
 0x150   :  { %v1233_v4 = vmax.f32 %v1169_v62, 0.0  ;;  %v1265_v5 = vmax.f32 %v1201_v63, 0.0 }
 0x151   :  { %v773_v6 = vpop.f32.mrf.mxu0  ;;  %v901_v7 = vpop.f32.mrf.mxu1 }
 0x152   :  { %v1859_v8 = vpack.c.bf16 %v1233_v4, %v1232_v2  ;;  %v1939_v9 = vpack.c.bf16 %v1265_v5, %v1264_v3  ;;  %v1170_v12 = vadd.f32 %v2443_v18, %v773_v6  ;;  %v1202_v13 = vadd.f32 %v2443_v18, %v901_v7 }
 0x153   :  { %v775_v10 = vpop.f32.mrf.mxu0  ;;  %v903_v11 = vpop.f32.mrf.mxu1 }
 0x154   :  { %1979 = vst [vmem:[%s2608_s3 + $0x48] sm:$0xff] %v1859_v8   ;;  %1995 = vst [vmem:[%s2608_s3 + $0xc8] sm:$0xff] %v1939_v9   ;;  %v1234_v21 = vmax.f32 %v1170_v12, 0.0  ;;  %v1266_v22 = vmax.f32 %v1202_v13, 0.0 }
 0x155   :  { %v776_v14 = vpop.f32.mrf.mxu0  ;;  %v904_v15 = vpop.f32.mrf.mxu1 }
 0x156   :  { %v1171_v16 = vadd.f32 %v2443_v18, %v776_v14  ;;  %v1203_v17 = vadd.f32 %v2443_v18, %v904_v15 }
 0x157   :  { %v778_v19 = vpop.f32.mrf.mxu0  ;;  %v906_v20 = vpop.f32.mrf.mxu1 }
 0x158   :  { %v1235_v23 = vmax.f32 %v1171_v16, 0.0  ;;  %v1267_v24 = vmax.f32 %v1203_v17, 0.0 }
 0x159   :  { %v781_v25 = vpop.f32.mrf.mxu0  ;;  %v909_v26 = vpop.f32.mrf.mxu1 }
 0x15a   :  { %v1864_v27 = vpack.c.bf16 %v1235_v23, %v1234_v21  ;;  %v1944_v28 = vpack.c.bf16 %v1267_v24, %v1266_v22  ;;  %v1172_v31 = vadd.f32 %v2443_v18, %v781_v25  ;;  %v1204_v32 = vadd.f32 %v2443_v18, %v909_v26 }
 0x15b   :  { %v783_v29 = vpop.f32.mrf.mxu0  ;;  %v911_v30 = vpop.f32.mrf.mxu1 }
 0x15c   :  { %1980 = vst [vmem:[%s2608_s3 + $0x50] sm:$0xff] %v1864_v27   ;;  %1996 = vst [vmem:[%s2608_s3 + $0xd0] sm:$0xff] %v1944_v28   ;;  %v1236_v39 = vmax.f32 %v1172_v31, 0.0  ;;  %v1268_v40 = vmax.f32 %v1204_v32, 0.0 }
 0x15d   :  { %v784_v33 = vpop.f32.mrf.mxu0  ;;  %v912_v34 = vpop.f32.mrf.mxu1 }
 0x15e   :  { %v1173_v35 = vadd.f32 %v2443_v18, %v784_v33  ;;  %v1205_v36 = vadd.f32 %v2443_v18, %v912_v34 }
 0x15f   :  { %v786_v37 = vpop.f32.mrf.mxu0  ;;  %v914_v38 = vpop.f32.mrf.mxu1 }
 0x160   :  { %v1237_v41 = vmax.f32 %v1173_v35, 0.0  ;;  %v1269_v42 = vmax.f32 %v1205_v36, 0.0 }
 0x161   :  { %v789_v43 = vpop.f32.mrf.mxu0  ;;  %v917_v44 = vpop.f32.mrf.mxu1 }
 0x162   :  { %v1869_v45 = vpack.c.bf16 %v1237_v41, %v1236_v39  ;;  %v1949_v46 = vpack.c.bf16 %v1269_v42, %v1268_v40  ;;  %v1174_v49 = vadd.f32 %v2443_v18, %v789_v43  ;;  %v1206_v50 = vadd.f32 %v2443_v18, %v917_v44 }
 0x163   :  { %v791_v47 = vpop.f32.mrf.mxu0  ;;  %v919_v48 = vpop.f32.mrf.mxu1 }
 0x164   :  { %1981 = vst [vmem:[%s2608_s3 + $0x58] sm:$0xff] %v1869_v45   ;;  %1997 = vst [vmem:[%s2608_s3 + $0xd8] sm:$0xff] %v1949_v46   ;;  %v1238_v57 = vmax.f32 %v1174_v49, 0.0  ;;  %v1270_v58 = vmax.f32 %v1206_v50, 0.0 }
 0x165   :  { %v792_v51 = vpop.f32.mrf.mxu0  ;;  %v920_v52 = vpop.f32.mrf.mxu1 }
 0x166   :  { %v1175_v53 = vadd.f32 %v2443_v18, %v792_v51  ;;  %v1207_v54 = vadd.f32 %v2443_v18, %v920_v52 }
 0x167   :  { %v794_v55 = vpop.f32.mrf.mxu0  ;;  %v922_v56 = vpop.f32.mrf.mxu1 }
 0x168   :  { %v1239_v59 = vmax.f32 %v1175_v53, 0.0  ;;  %v1271_v60 = vmax.f32 %v1207_v54, 0.0 }
 0x169   :  { %v797_v61 = vpop.f32.mrf.mxu0  ;;  %v925_v62 = vpop.f32.mrf.mxu1 }
 0x16a   :  { %v1874_v63 = vpack.c.bf16 %v1239_v59, %v1238_v57  ;;  %v1954_v0 = vpack.c.bf16 %v1271_v60, %v1270_v58  ;;  %v1176_v3 = vadd.f32 %v2443_v18, %v797_v61  ;;  %v1208_v4 = vadd.f32 %v2443_v18, %v925_v62 }
 0x16b   :  { %v799_v1 = vpop.f32.mrf.mxu0  ;;  %v927_v2 = vpop.f32.mrf.mxu1 }
 0x16c   :  { %1982 = vst [vmem:[%s2608_s3 + $0x60] sm:$0xff] %v1874_v63   ;;  %1998 = vst [vmem:[%s2608_s3 + $0xe0] sm:$0xff] %v1954_v0   ;;  %v1240_v11 = vmax.f32 %v1176_v3, 0.0  ;;  %v1272_v12 = vmax.f32 %v1208_v4, 0.0 }
 0x16d   :  { %v800_v5 = vpop.f32.mrf.mxu0  ;;  %v928_v6 = vpop.f32.mrf.mxu1 }
 0x16e   :  { %v1177_v7 = vadd.f32 %v2443_v18, %v800_v5  ;;  %v1209_v8 = vadd.f32 %v2443_v18, %v928_v6 }
 0x16f   :  { %v802_v9 = vpop.f32.mrf.mxu0  ;;  %v930_v10 = vpop.f32.mrf.mxu1 }
 0x170   :  { %v1241_v13 = vmax.f32 %v1177_v7, 0.0  ;;  %v1273_v14 = vmax.f32 %v1209_v8, 0.0 }
 0x171   :  { %v805_v15 = vpop.f32.mrf.mxu0  ;;  %v933_v16 = vpop.f32.mrf.mxu1 }
 0x172   :  { %v1879_v17 = vpack.c.bf16 %v1241_v13, %v1240_v11  ;;  %v1959_v19 = vpack.c.bf16 %v1273_v14, %v1272_v12  ;;  %v1178_v22 = vadd.f32 %v2443_v18, %v805_v15  ;;  %v1210_v23 = vadd.f32 %v2443_v18, %v933_v16 }
 0x173   :  { %v807_v20 = vpop.f32.mrf.mxu0  ;;  %v935_v21 = vpop.f32.mrf.mxu1 }
 0x174   :  { %1983 = vst [vmem:[%s2608_s3 + $0x68] sm:$0xff] %v1879_v17   ;;  %1999 = vst [vmem:[%s2608_s3 + $0xe8] sm:$0xff] %v1959_v19   ;;  %v1242_v30 = vmax.f32 %v1178_v22, 0.0  ;;  %v1274_v31 = vmax.f32 %v1210_v23, 0.0 }
 0x175   :  { %v808_v24 = vpop.f32.mrf.mxu0  ;;  %v936_v25 = vpop.f32.mrf.mxu1 }
 0x176   :  { %v1179_v26 = vadd.f32 %v2443_v18, %v808_v24  ;;  %v1211_v27 = vadd.f32 %v2443_v18, %v936_v25 }
 0x177   :  { %v810_v28 = vpop.f32.mrf.mxu0  ;;  %v938_v29 = vpop.f32.mrf.mxu1 }
 0x178   :  { %v1243_v32 = vmax.f32 %v1179_v26, 0.0  ;;  %v1275_v33 = vmax.f32 %v1211_v27, 0.0 }
 0x179   :  { %v813_v34 = vpop.f32.mrf.mxu0  ;;  %v941_v35 = vpop.f32.mrf.mxu1 }
 0x17a   :  { %v1884_v36 = vpack.c.bf16 %v1243_v32, %v1242_v30  ;;  %v1964_v37 = vpack.c.bf16 %v1275_v33, %v1274_v31  ;;  %v1180_v40 = vadd.f32 %v2443_v18, %v813_v34  ;;  %v1212_v41 = vadd.f32 %v2443_v18, %v941_v35 }
 0x17b   :  { %v815_v38 = vpop.f32.mrf.mxu0  ;;  %v943_v39 = vpop.f32.mrf.mxu1 }
 0x17c   :  { %1984 = vst [vmem:[%s2608_s3 + $0x70] sm:$0xff] %v1884_v36   ;;  %2000 = vst [vmem:[%s2608_s3 + $0xf0] sm:$0xff] %v1964_v37   ;;  %v1244_v48 = vmax.f32 %v1180_v40, 0.0  ;;  %v1276_v49 = vmax.f32 %v1212_v41, 0.0 }
 0x17d   :  { %v816_v42 = vpop.f32.mrf.mxu0  ;;  %v944_v43 = vpop.f32.mrf.mxu1 }
 0x17e   :  { %v1181_v44 = vadd.f32 %v2443_v18, %v816_v42  ;;  %v1213_v45 = vadd.f32 %v2443_v18, %v944_v43 }
 0x17f   :  { %v818_v46 = vpop.f32.mrf.mxu0  ;;  %v946_v47 = vpop.f32.mrf.mxu1 }
 0x180   :  { %v1245_v50 = vmax.f32 %v1181_v44, 0.0  ;;  %v1277_v51 = vmax.f32 %v1213_v45, 0.0 }
 0x182   :  { %v1889_v52 = vpack.c.bf16 %v1245_v50, %v1244_v48  ;;  %v1969_v53 = vpack.c.bf16 %v1277_v51, %v1276_v49 }
 0x184   :  { %1985 = vst [vmem:[%s2608_s3 + $0x78] sm:$0xff] %v1889_v52   ;;  %2001 = vst [vmem:[%s2608_s3 + $0xf8] sm:$0xff] %v1969_v53  }

</bundles_post_ra>
